<compile_context>
chip_gen: v5e
topology: v5e:2x2
jax: 0.10.0
libtpu: 0.0.40
codegen_flags: <defaults>
</compile_context>

<pallas_src>
import functools

import jax
import jax.numpy as jnp
from jax import lax
from jax.experimental import pallas as pl
from jax.experimental.pallas import tpu as pltpu


def _round_up(x, m):
    return ((x + m - 1) // m) * m


def rnn_chunk_kernel(x_ref, h0_ref, wx_ref, wr_ref, b_ref, out_ref, h_scr,
                     *, hidden_size, output_size):
    """One time-chunk of the recurrence.

    x_ref:   (TC, B, I)   inputs for this chunk
    h0_ref:  (B, P)       zero-padded initial hidden slab (resident)
    wx_ref:  (I, P)       fused, zero-padded input-projection weights (resident)
    wr_ref:  (P, P)       recurrent weights; rows >= H are zero (resident)
    b_ref:   (1, P)       fused, zero-padded bias (resident)
    out_ref: (TC, B, P)   per-step fused [hidden | log_probs | 0-pad] slab
    h_scr:   (B, P)       hidden slab carried across time chunks
    P = HO_pad (lane-dense multiple of 128), H = hidden_size, O = output_size.
    """
    c = pl.program_id(0)
    TC, B, I = x_ref.shape
    P = out_ref.shape[2]
    H, O = hidden_size, output_size

    @pl.when(c == 0)
    def _():
        h_scr[...] = h0_ref[...]

    # Non-recurrent input projection for the WHOLE chunk: one M = TC*B GEMM
    # with the bias folded in, hoisted off the serial recurrence chain.
    # Stash it in the lane-dense output slab (single big store); the per-step
    # results below overwrite it row by row.
    xproj = (
        jnp.dot(x_ref[...].reshape(TC * B, I), wx_ref[...],
                preferred_element_type=jnp.float32)
        + b_ref[...]
    ).reshape(TC, B, P)
    out_ref[...] = xproj

    # Per-chunk constants, hoisted out of the serial loop (JAX does not CSE
    # broadcast_in_dim across iterations).
    col = lax.broadcasted_iota(jnp.int32, (B, P), 1)
    is_out = jnp.logical_and(col >= H, col < H + O)  # zero-padded lanes excluded
    neg_inf = jnp.float32(-jnp.inf)

    def step(t, h_slab):
        # Recurrent part only.  Rows >= H of wr are zero, so the non-hidden
        # lanes of the carried slab contribute nothing -- no sub-128-lane slice
        # on the serial path.
        y = out_ref[t] + jnp.dot(h_slab, wr_ref[...],
                                 preferred_element_type=jnp.float32)
        # Numerically stable log-softmax over the O output lanes, in f32.
        z = jnp.where(is_out, y, neg_inf)
        m = jnp.max(z, axis=1, keepdims=True)
        s = jnp.sum(jnp.exp(z - m), axis=1, keepdims=True)
        logp = y - (jnp.log(s) + m)
        out_ref[t] = jnp.where(is_out, logp, y)
        return y  # full slab carry: hidden lanes = new hidden state

    h_last = lax.fori_loop(0, TC, step, h_scr[...], unroll=True)
    h_scr[...] = h_last


def rnn_sequence(inp_seq, h0, w_x, w_r, b_pad, *, hidden_size, output_size,
                 time_chunk=None):
    """Run the RNN over a whole sequence in ONE pallas_call.

    inp_seq: (T, B, I)   h0: (B, H)   w_x: (I, P)   w_r: (P, P)   b_pad: (1, P)
    Returns (log_probs (T, B, O), final_hidden (B, H)).
    """
    T, B, I = inp_seq.shape
    P = w_x.shape[1]
    H, O = hidden_size, output_size
    TC = T if time_chunk is None else time_chunk
    assert T % TC == 0, "sequence length must be a multiple of the time chunk"

    h0_pad = jnp.pad(h0.astype(jnp.float32), ((0, 0), (0, P - H)))

    kernel = functools.partial(rnn_chunk_kernel,
                               hidden_size=H, output_size=O)

    fused = pl.pallas_call(
        kernel,
        out_shape=jax.ShapeDtypeStruct((T, B, P), jnp.float32),
        grid_spec=pltpu.PrefetchScalarGridSpec(
            num_scalar_prefetch=0,
            grid=(T // TC,),
            in_specs=[
                pl.BlockSpec((TC, B, I), lambda c: (c, 0, 0)),  # x chunk
                pl.BlockSpec((B, P), lambda c: (0, 0)),         # h0 (resident)
                pl.BlockSpec((I, P), lambda c: (0, 0)),         # W_x (resident)
                pl.BlockSpec((P, P), lambda c: (0, 0)),         # W_r (resident)
                pl.BlockSpec((1, P), lambda c: (0, 0)),         # bias (resident)
            ],
            out_specs=pl.BlockSpec((TC, B, P), lambda c: (c, 0, 0)),
            scratch_shapes=[pltpu.VMEM((B, P), jnp.float32)],
        ),
        compiler_params=pltpu.CompilerParams(
            # Time chunks carry the hidden state -> must run sequentially.
            # TODO(synk): for v7x, add a leading "parallel" batch-shard axis
            # (with per-shard hidden scratch) once B is large enough to split.
            dimension_semantics=("arbitrary",),
        ),
    )(inp_seq, h0_pad, w_x, w_r, b_pad)

    log_probs = fused[:, :, H:H + O]
    final_hidden = fused[-1, :, :H]
    return log_probs, final_hidden


def rnn_forward(inp, hidden, w_x, w_r, b_pad, *, hidden_size, output_size):
    """Pallas equivalent of RNN.forward(input, hidden) -> (log_probs, hidden)."""
    log_probs, new_hidden = rnn_sequence(
        inp[None], hidden, w_x, w_r, b_pad,
        hidden_size=hidden_size, output_size=output_size)
    return log_probs[0], new_hidden


def init_params(key, input_size, hidden_size, output_size):
    """Deterministic init mimicking nn.Linear (uniform +/- 1/sqrt(fan_in)).

    Weights stored transposed: (in_features, out_features)."""
    d_in = input_size + hidden_size
    k1, k2, k3, k4 = jax.random.split(key, 4)
    bound = 1.0 / jnp.sqrt(jnp.float32(d_in))
    w_o = jax.random.uniform(k1, (d_in, output_size), jnp.float32, -bound, bound)
    b_o = jax.random.uniform(k2, (1, output_size), jnp.float32, -bound, bound)
    w_h = jax.random.uniform(k3, (d_in, hidden_size), jnp.float32, -bound, bound)
    b_h = jax.random.uniform(k4, (1, hidden_size), jnp.float32, -bound, bound)
    return w_o, b_o, w_h, b_h


def fuse_and_pad_params(w_o, b_o, w_h, b_h, input_size, hidden_size, output_size):
    """Fuse i2h / i2o along N (hidden cols first, then output cols), zero-pad
    the fused columns to a lane-dense multiple of 128, split into an input
    projection W_x (I, P) and a recurrent W_r (P, P) whose rows >= H are zero."""
    I, H, O = input_size, hidden_size, output_size
    P = max(128, _round_up(H + O, 128))
    w_cat = jnp.concatenate([w_h, w_o], axis=1)                 # (I+H, H+O)
    b_cat = jnp.concatenate([b_h, b_o], axis=1)                 # (1, H+O)
    w_cat = jnp.pad(w_cat, ((0, 0), (0, P - (H + O))))          # lane-dense cols
    b_pad = jnp.pad(b_cat, ((0, 0), (0, P - (H + O))))
    w_x = w_cat[:I]                                             # (I, P)
    w_r = jnp.zeros((P, P), jnp.float32).at[:H].set(w_cat[I:])  # (P, P), rows>=H zero
    return w_x, w_r, b_pad


if __name__ == "__main__":
    input_size, hidden_size, output_size = 16, 32, 8
    batch, seq_len = 2, 8

    key = jax.random.PRNGKey(0)
    kx, kp = jax.random.split(key, 2)

    inp_seq = jax.random.normal(kx, (seq_len, batch, input_size), jnp.float32)
    hidden0 = jnp.zeros((batch, hidden_size), jnp.float32)  # RNN.initHidden()
    w_o, b_o, w_h, b_h = init_params(kp, input_size, hidden_size, output_size)
    w_x, w_r, b_pad = fuse_and_pad_params(
        w_o, b_o, w_h, b_h, input_size, hidden_size, output_size)

    # ---- single-step forward (exact module semantics) ----
    out1, hid1 = rnn_forward(inp_seq[0], hidden0, w_x, w_r, b_pad,
                             hidden_size=hidden_size, output_size=output_size)
    jax.block_until_ready((out1, hid1))

    x_cat = jnp.concatenate((inp_seq[0], hidden0), axis=1)
    h_ref = x_cat @ w_h + b_h
    o_ref = jax.nn.log_softmax(x_cat @ w_o + b_o, axis=1)
    assert jnp.allclose(out1, o_ref, atol=1e-4), "single-step output mismatch"
    assert jnp.allclose(hid1, h_ref, atol=1e-4), "single-step hidden mismatch"

    # ---- full sequence in ONE pallas_call, one grid step (in-kernel time loop) ----
    logp_seq, hid_T = rnn_sequence(inp_seq, hidden0, w_x, w_r, b_pad,
                                   hidden_size=hidden_size,
                                   output_size=output_size)
    jax.block_until_ready((logp_seq, hid_T))

    h = hidden0
    refs = []
    for t in range(seq_len):
        xc = jnp.concatenate((inp_seq[t], h), axis=1)
        z = xc @ w_o + b_o
        h = xc @ w_h + b_h
        refs.append(jax.nn.log_softmax(z, axis=1))
    ref_seq = jnp.stack(refs)
    assert jnp.allclose(logp_seq, ref_seq, atol=1e-4), "sequence output mismatch"
    assert jnp.allclose(hid_T, h, atol=1e-4), "sequence hidden mismatch"

    print("KERNEL_OK")
</pallas_src>

<mosaic_0001>
module attributes {stable_mosaic.version = 11 : i64} {
  func.func @rnn_chunk_kernel(%arg0: i32, %arg1: memref<1x2x16xf32, #tpu.memory_space<vmem>>, %arg2: memref<2x128xf32, #tpu.memory_space<vmem>>, %arg3: memref<16x128xf32, #tpu.memory_space<vmem>>, %arg4: memref<128x128xf32, #tpu.memory_space<vmem>>, %arg5: memref<1x128xf32, #tpu.memory_space<vmem>>, %arg6: memref<1x2x128xf32, #tpu.memory_space<vmem>>, %arg7: memref<2x128xf32, #tpu.memory_space<vmem>>) attributes {dimension_semantics = [#tpu.dimension_semantics<arbitrary>], iteration_bounds = array<i64: 1>, scalar_prefetch = 0 : i64, scratch_operands = 1 : i64, tpu.core_type = #tpu.core_type<tc>, window_params = [{transform_indices = @transform_0, window_bounds = array<i64: 1, 2, 16>}, {pipeline_mode = #tpu.pipeline_mode<synchronous>, transform_indices = @transform_1, window_bounds = array<i64: 2, 128>}, {pipeline_mode = #tpu.pipeline_mode<synchronous>, transform_indices = @transform_2, window_bounds = array<i64: 16, 128>}, {pipeline_mode = #tpu.pipeline_mode<synchronous>, transform_indices = @transform_3, window_bounds = array<i64: 128, 128>}, {pipeline_mode = #tpu.pipeline_mode<synchronous>, transform_indices = @transform_4, window_bounds = array<i64: 1, 128>}, {transform_indices = @transform_5, window_bounds = array<i64: 1, 2, 128>}]} {
    %c0_i32 = arith.constant 0 : i32
    %0 = arith.cmpi eq, %arg0, %c0_i32 : i32
    %1 = arith.extui %0 : i1 to i32
    %c0_i32_0 = arith.constant 0 : i32
    %2 = arith.cmpi ne, %1, %c0_i32_0 : i32
    scf.if %2 {
      %c0_25 = arith.constant 0 : index
      %c0_26 = arith.constant 0 : index
      %44 = vector.load %arg2[%c0_25, %c0_26] : memref<2x128xf32, #tpu.memory_space<vmem>>, vector<2x128xf32>
      %c0_27 = arith.constant 0 : index
      %c0_28 = arith.constant 0 : index
      %45 = vector.load %arg7[%c0_27, %c0_28] : memref<2x128xf32, #tpu.memory_space<vmem>>, vector<2x128xf32>
      tpu.vector_store %arg7[%c0_27, %c0_28], %44 {strides = array<i32>} : memref<2x128xf32, #tpu.memory_space<vmem>>, vector<2x128xf32>,
    } else {
    }
    %c0 = arith.constant 0 : index
    %c0_1 = arith.constant 0 : index
    %c0_2 = arith.constant 0 : index
    %3 = vector.load %arg1[%c0, %c0_1, %c0_2] : memref<1x2x16xf32, #tpu.memory_space<vmem>>, vector<1x2x16xf32>
    %4 = vector.shape_cast %3 : vector<1x2x16xf32> to vector<2x16xf32>
    %c0_3 = arith.constant 0 : index
    %c0_4 = arith.constant 0 : index
    %5 = vector.load %arg3[%c0_3, %c0_4] : memref<16x128xf32, #tpu.memory_space<vmem>>, vector<16x128xf32>
    %cst = arith.constant dense<0.000000e+00> : vector<2x128xf32>
    %6 = tpu.matmul %4, %5, %cst {dimension_numbers = #tpu.dot_dimension_numbers<[1], [0], [0], [1], [0, 0, 1, 1], [], []>} : vector<2x16xf32>, vector<16x128xf32>, vector<2x128xf32> -> vector<2x128xf32>
    %c0_5 = arith.constant 0 : index
    %c0_6 = arith.constant 0 : index
    %7 = vector.load %arg5[%c0_5, %c0_6] : memref<1x128xf32, #tpu.memory_space<vmem>>, vector<1x128xf32>
    %8 = vector.broadcast %7 : vector<1x128xf32> to vector<2x128xf32>
    %9 = arith.addf %6, %8 : vector<2x128xf32>
    %10 = vector.shape_cast %9 : vector<2x128xf32> to vector<1x2x128xf32>
    %c0_7 = arith.constant 0 : index
    %c0_8 = arith.constant 0 : index
    %c0_9 = arith.constant 0 : index
    %11 = vector.load %arg6[%c0_7, %c0_8, %c0_9] : memref<1x2x128xf32, #tpu.memory_space<vmem>>, vector<1x2x128xf32>
    tpu.vector_store %arg6[%c0_7, %c0_8, %c0_9], %10 {strides = array<i32>} : memref<1x2x128xf32, #tpu.memory_space<vmem>>, vector<1x2x128xf32>,
    %12 = tpu.iota {dimensions = array<i32: 1>} : vector<2x128xi32>
    %c32_i32 = arith.constant 32 : i32
    %13 = vector.broadcast %c32_i32 : i32 to vector<2x128xi32>
    %14 = arith.cmpi sge, %12, %13 : vector<2x128xi32>
    %c40_i32 = arith.constant 40 : i32
    %15 = vector.broadcast %c40_i32 : i32 to vector<2x128xi32>
    %16 = arith.cmpi slt, %12, %15 : vector<2x128xi32>
    %17 = arith.andi %14, %16 : vector<2x128xi1>
    %c0_10 = arith.constant 0 : index
    %c0_11 = arith.constant 0 : index
    %18 = vector.load %arg7[%c0_10, %c0_11] : memref<2x128xf32, #tpu.memory_space<vmem>>, vector<2x128xf32>
    %cst_12 = arith.constant 0xFF800000 : f32
    %c0_i32_13 = arith.constant 0 : i32
    %19 = arith.index_cast %c0_i32_13 : i32 to index
    %c0_14 = arith.constant 0 : index
    %c0_15 = arith.constant 0 : index
    %20 = vector.load %arg6[%19, %c0_14, %c0_15] : memref<1x2x128xf32, #tpu.memory_space<vmem>>, vector<1x2x128xf32>
    %21 = vector.shape_cast %20 : vector<1x2x128xf32> to vector<2x128xf32>
    %c0_16 = arith.constant 0 : index
    %c0_17 = arith.constant 0 : index
    %22 = vector.load %arg4[%c0_16, %c0_17] : memref<128x128xf32, #tpu.memory_space<vmem>>, vector<128x128xf32>
    %cst_18 = arith.constant dense<0.000000e+00> : vector<2x128xf32>
    %23 = tpu.matmul %18, %22, %cst_18 {dimension_numbers = #tpu.dot_dimension_numbers<[1], [0], [0], [1], [0, 0, 1, 1], [], []>} : vector<2x128xf32>, vector<128x128xf32>, vector<2x128xf32> -> vector<2x128xf32>
    %24 = arith.addf %21, %23 : vector<2x128xf32>
    %25 = vector.broadcast %cst_12 : f32 to vector<2x128xf32>
    %26 = arith.select %17, %24, %25 : vector<2x128xi1>, vector<2x128xf32>
    %cst_19 = arith.constant dense<0xFF800000> : vector<2xf32>
    %27 = vector.multi_reduction <maximumf>, %26, %cst_19 [1] : vector<2x128xf32> to vector<2xf32>
    %28 = vector.shape_cast %27 : vector<2xf32> to vector<2x1xf32>
    %29 = vector.broadcast %28 : vector<2x1xf32> to vector<2x128xf32>
    %30 = arith.subf %26, %29 : vector<2x128xf32>
    %31 = math.exp %30 : vector<2x128xf32>
    %cst_20 = arith.constant dense<0.000000e+00> : vector<2xf32>
    %32 = vector.multi_reduction <add>, %31, %cst_20 [1] : vector<2x128xf32> to vector<2xf32>
    %33 = vector.shape_cast %32 : vector<2xf32> to vector<2x1xf32>
    %34 = math.log %33 : vector<2x1xf32>
    %35 = arith.addf %34, %28 : vector<2x1xf32>
    %36 = vector.broadcast %35 : vector<2x1xf32> to vector<2x128xf32>
    %37 = arith.subf %24, %36 : vector<2x128xf32>
    %38 = arith.select %17, %37, %24 : vector<2x128xi1>, vector<2x128xf32>
    %39 = arith.index_cast %c0_i32_13 : i32 to index
    %c0_21 = arith.constant 0 : index
    %c0_22 = arith.constant 0 : index
    %40 = vector.load %arg6[%39, %c0_21, %c0_22] : memref<1x2x128xf32, #tpu.memory_space<vmem>>, vector<1x2x128xf32>
    %41 = vector.shape_cast %40 : vector<1x2x128xf32> to vector<2x128xf32>
    %42 = vector.shape_cast %38 : vector<2x128xf32> to vector<1x2x128xf32>
    tpu.vector_store %arg6[%39, %c0_21, %c0_22], %42 {strides = array<i32>} : memref<1x2x128xf32, #tpu.memory_space<vmem>>, vector<1x2x128xf32>,
    %c1_i32 = arith.constant 1 : i32
    %c0_23 = arith.constant 0 : index
    %c0_24 = arith.constant 0 : index
    %43 = vector.load %arg7[%c0_23, %c0_24] : memref<2x128xf32, #tpu.memory_space<vmem>>, vector<2x128xf32>
    tpu.vector_store %arg7[%c0_23, %c0_24], %24 {strides = array<i32>} : memref<2x128xf32, #tpu.memory_space<vmem>>, vector<2x128xf32>,
    return
  }
  func.func @transform_0(%arg0: i32) -> (i32, i32, i32) {
    %c0_i32 = arith.constant 0 : i32
    %c0_i32_0 = arith.constant 0 : i32
    %c0_i32_1 = arith.constant 0 : i32
    return %arg0, %c0_i32, %c0_i32_0 : i32, i32, i32
  }
  func.func @transform_1(%arg0: i32) -> (i32, i32) {
    %c0_i32 = arith.constant 0 : i32
    %c0_i32_0 = arith.constant 0 : i32
    %c0_i32_1 = arith.constant 0 : i32
    return %c0_i32, %c0_i32_0 : i32, i32
  }
  func.func @transform_2(%arg0: i32) -> (i32, i32) {
    %c0_i32 = arith.constant 0 : i32
    %c0_i32_0 = arith.constant 0 : i32
    %c0_i32_1 = arith.constant 0 : i32
    return %c0_i32, %c0_i32_0 : i32, i32
  }
  func.func @transform_3(%arg0: i32) -> (i32, i32) {
    %c0_i32 = arith.constant 0 : i32
    %c0_i32_0 = arith.constant 0 : i32
    %c0_i32_1 = arith.constant 0 : i32
    return %c0_i32, %c0_i32_0 : i32, i32
  }
  func.func @transform_4(%arg0: i32) -> (i32, i32) {
    %c0_i32 = arith.constant 0 : i32
    %c0_i32_0 = arith.constant 0 : i32
    %c0_i32_1 = arith.constant 0 : i32
    return %c0_i32, %c0_i32_0 : i32, i32
  }
  func.func @transform_5(%arg0: i32) -> (i32, i32, i32) {
    %c0_i32 = arith.constant 0 : i32
    %c0_i32_0 = arith.constant 0 : i32
    %c0_i32_1 = arith.constant 0 : i32
    return %arg0, %c0_i32, %c0_i32_0 : i32, i32, i32
  }
}

</mosaic_0001>

<bundles_post_ra>
// kernel: tpu_custom_call.1
= control target key start
LH: loop header
LB: loop body
LE: loop exit
PB: predicated region body
PF: predicated region fallthrough
CT: control target
= control target key end

     0   :  { %10 = vsyncpa [#allocation4], 0  ;;  %s403_s0 = inlined_call_operand.hbm [shape: f32[1,2,16], index: 0, kind: input, shape index: {}]   ;;  %s404_s1 = inlined_call_operand.hbm [shape: f32[2,128], index: 1, kind: input, shape index: {}]   ;;  %s405_s2 = inlined_call_operand.hbm [shape: f32[16,128], index: 2, kind: input, shape index: {}]   ;;  %s406_s3 = inlined_call_operand.hbm [shape: f32[128,128], index: 3, kind: input, shape index: {}]   ;;  %s407_s4 = inlined_call_operand.vmem [shape: f32[1,128], index: 4, kind: input, shape index: {}]   ;;  %s408_s5 = inlined_call_operand.hbm [shape: f32[1,2,128], index: 5, kind: output, shape index: {}]  }
   0x1   :  { %11 = vsyncpa [#allocation7], 0 }
   0x2   :  { %12 = vsyncpa [#allocation10], 0  ;;  %s30_s20 = sshll.u32 %s404_s1, 4  ;;  %s31_s20 = int_to_ptr.hbm [resolvable:$true] %s30_s20 }
   0x3   :  { %13 = vsyncpa [#allocation5], 0  ;;  %s340_s21 = smov [#allocation6]   ;;  %s19_s25 = sshll.u32 %s403_s0, 4  ;;  %s20_s25 = int_to_ptr.hbm [resolvable:$true] %s19_s25 }
   0x4   :  { %s32_s22 = sshll.u32 %s340_s21, 4  ;;  %s341_s26 = smov [#allocation3]   ;;  %s33_s22 = int_to_ptr.vmem [resolvable:$true] %s32_s22 }
   0x5   :  { %35 = dma.hbm_to_vmem [thread:$0]  %s31_s20, 32, %s33_s22, [#allocation7]  }
   0x6   :  { %s21_s27 = sshll.u32 %s341_s26, 4  ;;  %s40_s30 = sshll.u32 %s405_s2, 4  ;;  %s22_s27 = int_to_ptr.vmem [resolvable:$true] %s21_s27  ;;  %s41_s30 = int_to_ptr.hbm [resolvable:$true] %s40_s30 }
   0x7   :  { %24 = dma.hbm_to_vmem [thread:$0]  %s20_s25, 32, %s22_s27, [#allocation4]  }
   0x8   :  { %s342_s1 = smov [#allocation8]   ;;  %s53_s9 = sshll.u32 %s406_s3, 4  ;;  %s54_s9 = int_to_ptr.hbm [resolvable:$true] %s53_s9 }
   0x9   :  { %s42_s6 = sshll.u32 %s342_s1, 4  ;;  %s343_s10 = smov 128   ;;  %s43_s6 = int_to_ptr.vmem [resolvable:$true] %s42_s6 }
   0xa   :  { %s344_s0 = smov 8   ;;  %s345_s11 = smov [#allocation9]  }
   0xb   :  { %48 = dma.hbm_to_vmem [thread:$0]  %s41_s30, 256, %s43_s6, [#allocation7], %s343_s10, %s343_s10, %s344_s0  }
   0xc   :  { %s55_s12 = sshll.u32 %s345_s11, 4  ;;  %s56_s12 = int_to_ptr.vmem [resolvable:$true] %s55_s12 }
   0xd   :  { %61 = dma.hbm_to_vmem [thread:$0]  %s54_s9, 2048, %s56_s12, [#allocation10], %s343_s10, %s343_s10, %s344_s0  }
   0xe   :  { %332 = dma.done.wait [#allocation4], 32  }
   0xf   :  { %333 = vsyncadd [#allocation4], 4294967264 }
  0x10   :  { %334 = dma.done.wait [#allocation7], 288  }
  0x11   :  { %335 = vsyncadd [#allocation7], 4294967008 }
  0x12   :  { %336 = dma.done.wait [#allocation10], 2048  }
  0x13   :  { %337 = vsyncadd [#allocation10], 4294965248  ;;  %v140_v0 = vld [vmem:[#allocation9 + $0x78] sm:$0xff]  ;;  %v139_v1 = vld [vmem:[#allocation9 + $0x70] sm:$0xff]  ;;  %vm93_vm0 = vcmask 130048   ;;  %v118_v24 = vlaneseq  ;;  %vm163_vm4 = vcmask 1041408  }
  0x14   :  { %141 = vmatpush.msra.mxu1 %v140_v0  ;;  %v138_v2 = vld [vmem:[#allocation9 + $0x68] sm:$0xff]  ;;  %v88_v3 = vld [vmem:[#allocation8 + $0x8] sm:$0xff]  ;;  %v87_v4 = vld [vmem:[#allocation8] sm:$0xff]  ;;  %s187_s16 = sshll.u32 %s408_s5, 4  ;;  %s188_s16 = int_to_ptr.hbm [resolvable:$true] %s187_s16 }
  0x15   :  { %v137_v5 = vld [vmem:[#allocation9 + $0x60] sm:$0xff]  ;;  %111 = vmatpush.msra.mxu0 %v88_v3  ;;  %v86_v6 = vld [vmem:[#allocation3] sm:$0x3]  ;;  %v136_v7 = vld [vmem:[#allocation9 + $0x58] sm:$0xff]  ;;  %v119_v25 = vand.u32 127, %v118_v24 }
  0x16   :  { %142 = vmatpush.msra.mxu1 %v139_v1  ;;  %v84_v8 = vld [vmem:[#allocation6] sm:$0x3]  ;;  %v135_v9 = vld [vmem:[#allocation9 + $0x50] sm:$0xff]  ;;  %v133_v11 = vld [vmem:[#allocation9 + $0x40] sm:$0xff] }
  0x17   :  { %112 = vmatpush.msra.mxu0 %v87_v4  ;;  %85 = vst [vmem:[#allocation2] sm:$0x3] %v84_v8  ;;  %v134_v10 = vld [vmem:[#allocation9 + $0x48] sm:$0xff]  ;;  %v132_v12 = vld [vmem:[#allocation9 + $0x38] sm:$0xff]  ;;  %v131_v13 = vld [vmem:[#allocation9 + $0x30] sm:$0xff]  ;;  %vm120_vm1 = vcmp.ge.s32.totalorder %v119_v25, 32 }
  0x18   :  { %143 = vmatpush.msra.mxu1 %v138_v2  ;;  %199 = vmatmul.msk.f32.vlgmr.msra.gmra.mxu0 %vm93_vm0, %v86_v6  ;;  %v130_v14 = vld [vmem:[#allocation9 + $0x28] sm:$0xff]  ;;  %v129_v15 = vld [vmem:[#allocation9 + $0x20] sm:$0xff]  ;;  %v128_v16 = vld [vmem:[#allocation9 + $0x18] sm:$0xff]  ;;  %vm121_vm2 = vcmp.lt.s32.totalorder %v119_v25, 40 }
  0x19   :  { %v127_v17 = vld [vmem:[#allocation9 + $0x10] sm:$0xff]  ;;  %v126_v18 = vld [vmem:[#allocation9 + $0x8] sm:$0xff]  ;;  %v125_v19 = vld [vmem:[#allocation9] sm:$0xff] }
  0x1a   :  { %144 = vmatpush.msra.mxu1 %v137_v5  ;;  %v207_v21 = vld [vmem:[%s407_s4] ss:$0 sm:$0xff]  ;;  %vm392_vm3 = vmand %vm120_vm1, %vm121_vm2  ;;  %s346_s4 = smov [#allocation11]  }
  0x1b   :  { %s185_s13 = sshll.u32 %s346_s4, 4  ;;  %s186_s13 = int_to_ptr.vmem [resolvable:$true] %s185_s13 }
  0x1c   :  { %145 = vmatpush.msra.mxu1 %v136_v7 }
  0x1e   :  { %146 = vmatpush.msra.mxu1 %v135_v9  ;;  %v123_v20 = vld [vmem:[#allocation2] sm:$0x3] }
  0x20   :  { %147 = vmatpush.msra.mxu1 %v134_v10 }
  0x22   :  { %148 = vmatpush.msra.mxu1 %v133_v11 }
  0x24   :  { %149 = vmatpush.msra.mxu1 %v132_v12 }
  0x26   :  { %150 = vmatpush.msra.mxu1 %v131_v13 }
  0x28   :  { %151 = vmatpush.msra.mxu1 %v130_v14 }
  0x2a   :  { %152 = vmatpush.msra.mxu1 %v129_v15 }
  0x2c   :  { %153 = vmatpush.msra.mxu1 %v128_v16 }
  0x2e   :  { %154 = vmatpush.msra.mxu1 %v127_v17 }
  0x30   :  { %155 = vmatpush.msra.mxu1 %v126_v18 }
  0x32   :  { %156 = vmatpush.msra.mxu1 %v125_v19 }
  0x33   :  { %157 = vmatmul.f32.vlgmr.msra.gmra.mxu1 %v123_v20 }
  0x95   :  { %v114_v22 = vpop.f32.mrf.mxu0 }
  0x96   :  { %v115_v23 = vadd.f32 %v207_v21, %v114_v22 }
  0x98   :  { %117 = vst [vmem:[#allocation11] sm:$0x3] %v115_v23 }
  0x9f   :  { %v124_v26 = vld [vmem:[#allocation11] sm:$0x3] }
  0xb0   :  { %v158_v27 = vpop.f32.mrf.mxu1 }
  0xb1   :  { %v161_v29 = vadd.f32 %v158_v27, %v124_v26 }
  0xb3   :  { %179 = vst [vmem:[#allocation2] sm:$0x3] %v161_v29  ;;  %v162_v30 = vsel %vm392_vm3, %v161_v29, -inf }
  0xb4   :  { %v164_v31 = vsel %vm163_vm4, %v162_v30, -inf }
  0xb5   :  { %165 = vmax.xlane.f32.xlu0 %v164_v31 }
 0x128   :  { %v166_v32 = vpop.xlane.xlu0 %165 }
 0x129   :  { %v167_v33 = vsub.f32 %v162_v30, %v166_v32 }
 0x12b   :  { %v168_v34 = vmul.f32 1.442695, %v167_v33 }
 0x12d   :  { %208 = vpow2.f32 %v168_v34 }
 0x133   :  { %v209_v35 = vpop.eup %208 }
 0x134   :  { %v170_v36 = vsel %vm163_vm4, %v209_v35, 0.0 }
 0x135   :  { %171 = vadd.xlane.f32.xlu0 %v170_v36 }
 0x1a8   :  { %v172_v37 = vpop.xlane.xlu0 %171 }
 0x1a9   :  { %210 = vlog2.f32 %v172_v37 }
 0x1af   :  { %v211_v38 = vpop.eup %210 }
 0x1b0   :  { %v174_v39 = vmul.f32 0.6931472, %v211_v38 }
 0x1b2   :  { %v175_v40 = vadd.f32 %v174_v39, %v166_v32 }
 0x1b4   :  { %v176_v41 = vsub.f32 %v161_v29, %v175_v40 }
 0x1b6   :  { %v177_v42 = vsel %vm392_vm3, %v176_v41, %v161_v29 }
 0x1b7   :  { %178 = vst [vmem:[#allocation11] sm:$0x3] %v177_v42 }
 0x1b8   :  { %190 = dma.vmem_to_hbm [thread:$0]  %s186_s13, 32, %s188_s16, [#allocation5]  }
 0x1b9   :  { %338 = dma.done.wait [#allocation5], 32  }
 0x1ba   :  { %339 = vsyncadd [#allocation5], 4294967264 }
 0x1bb   :  { %195 = vsyncpa [#allocation4], 1 }
 0x1bc   :  { %196 = vsyncpa [#allocation7], 1 }
 0x1bd   :  { %197 = vsyncpa [#allocation10], 1 }
 0x1be   :  { %198 = vsyncpa [#allocation5], 1 }

</bundles_post_ra>
